<compile_context>
chip_gen: v6e
topology: v6e:2x2x1
jax: 0.10.0
libtpu: 0.0.40
codegen_flags: <defaults>
</compile_context>

<pallas_src>
import functools

import jax
import jax.numpy as jnp
from jax.experimental import pallas as pl
from jax.experimental.pallas import tpu as pltpu


# ---------------------------------------------------------------------------
# Pallas kernel: row-gather embedding lookup + positional add (+ dropout mask)
# ---------------------------------------------------------------------------
def _sentence_embedding_kernel(ids_ref,                      # scalar-prefetch (SMEM), (B*S,)
                               tab_hbm, pe_ref, *rest,       # HBM table, VMEM PE slab, [keep], out, scratch
                               rows_per_step, train):
    if train:
        keep_ref, out_ref, buf, sems = rest                  # keep_ref already holds 0 or 1/(1-p)
    else:
        keep_ref = None
        out_ref, buf, sems = rest

    step = pl.program_id(0)
    base = step * rows_per_step

    # --- Gather: DMA only the needed embedding rows HBM -> VMEM (table never fully resident).
    @pl.loop(0, rows_per_step)
    def _(r):
        row = ids_ref[base + r]                              # SMEM scalar read
        pltpu.make_async_copy(tab_hbm.at[row], buf.at[r], sems.at[r]).start()

    @pl.loop(0, rows_per_step)
    def _(r):
        # Shape-matching descriptor; waits on the r-th row's semaphore.
        pltpu.make_async_copy(tab_hbm.at[0], buf.at[r], sems.at[r]).wait()

    # --- Add positional encoding (pe_ref is pre-tiled to rows_per_step whole sentences).
    x = buf[...].astype(jnp.float32) + pe_ref[...]

    # --- Inverted dropout (train only): single vmul by the precomputed keep-scale mask.
    if train:
        x = x * keep_ref[...]

    out_ref[...] = x.astype(out_ref.dtype)                   # lane-dense store (D % 128 == 0)


def sentence_embedding_pallas(ids, table, pe, *, p=0.1, train=False, rng_key=None,
                              rows_per_step=None):
    """ids: (B, S) int32; table: (V, D); pe: (S, D) f32  ->  (B, S, D) f32."""
    B, S = ids.shape
    V, D = table.shape
    N = B * S

    # The PyTorch module only warns on invalid indices; clamp so the gather DMA stays in-bounds.
    # TODO(synk): the reference prints a warning on invalid indices; host-side check not replicated.
    ids_flat = jnp.clip(ids.reshape(N), 0, V - 1).astype(jnp.int32)

    if rows_per_step is None:
        # One big slab for small inputs; cap around ~1024 rows (whole sentences) for large N.
        cap = max(S, (1024 // S) * S)
        rows_per_step = N if N <= cap else cap
    assert rows_per_step % S == 0, "chunks must cover whole sentences (for the PE add)"
    assert N % rows_per_step == 0, "B*S must be divisible by rows_per_step"
    num_steps = N // rows_per_step
    sent_per_step = rows_per_step // S

    # PE tiled once (outside the kernel) to the per-step slab; stays VMEM-resident across steps.
    pe_tiled = jnp.tile(pe.astype(jnp.float32), (sent_per_step, 1))        # (rows_per_step, D)

    in_specs = [
        pl.BlockSpec(memory_space=pl.ANY),                                 # embedding table in HBM
        pl.BlockSpec((rows_per_step, D), lambda i, ids: (0, 0)),           # resident PE slab
    ]
    inputs = [ids_flat, table, pe_tiled]

    if train:
        if rng_key is None:
            rng_key = jax.random.PRNGKey(0)
        # Keep-scale mask: 1/(1-p) with prob (1-p), else 0.  Generated with jax.random outside the
        # kernel (in-kernel hardware PRNG has no CPU-interpret lowering); applied in-kernel.
        keep = jax.random.bernoulli(rng_key, 1.0 - p, (N, D))
        keep_scale = jnp.where(keep, 1.0 / (1.0 - p), 0.0).astype(jnp.float32)
        in_specs.append(pl.BlockSpec((rows_per_step, D), lambda i, ids: (i, 0)))
        inputs.append(keep_scale)

    kernel = functools.partial(_sentence_embedding_kernel,
                               rows_per_step=rows_per_step, train=train)

    out_flat = pl.pallas_call(
        kernel,
        out_shape=jax.ShapeDtypeStruct((N, D), jnp.float32),
        grid_spec=pltpu.PrefetchScalarGridSpec(
            num_scalar_prefetch=1,                                         # ids_flat -> SMEM
            grid=(num_steps,),
            in_specs=in_specs,
            out_specs=pl.BlockSpec((rows_per_step, D), lambda i, ids: (i, 0)),
            scratch_shapes=[
                pltpu.VMEM((rows_per_step, D), table.dtype),               # gathered rows
                pltpu.SemaphoreType.DMA((rows_per_step,)),                  # one sem per row DMA
            ],
        ),
        compiler_params=pltpu.CompilerParams(dimension_semantics=("parallel",)),
    )(*inputs)

    return out_flat.reshape(B, S, D)


# ---------------------------------------------------------------------------
# Glue: tokenization (string -> int ids) and sinusoidal positional encoding
# ---------------------------------------------------------------------------
def tokenize(sentence, start_token, end_token, language2idx, max_sequence_len,
             START_TOKEN, END_TOKEN, PADDING_TOKEN):
    word_indices = [language2idx[t] for t in list(sentence)]
    if len(word_indices) > max_sequence_len - 2:
        word_indices = word_indices[: max_sequence_len - 2]
    if start_token:
        word_indices.insert(0, language2idx[START_TOKEN])
    if end_token:
        word_indices.append(language2idx[END_TOKEN])
    while len(word_indices) < max_sequence_len:
        word_indices.append(language2idx[PADDING_TOKEN])
    return word_indices


def batch_tokenize(batch, start_token, end_token, language2idx, max_sequence_len,
                   START_TOKEN, END_TOKEN, PADDING_TOKEN):
    rows = [
        tokenize(s, start_token, end_token, language2idx, max_sequence_len,
                 START_TOKEN, END_TOKEN, PADDING_TOKEN)
        for s in batch
    ]
    return jnp.asarray(rows, dtype=jnp.int32)                              # (B, S)


def positional_encoding(max_sequence_len, model_dim):
    pos = jnp.arange(max_sequence_len, dtype=jnp.float32)[:, None]         # (S, 1)
    i = jnp.arange(0, model_dim, 2, dtype=jnp.float32)                     # (D/2,)
    denom = jnp.power(10000.0, i / model_dim)
    pe = jnp.zeros((max_sequence_len, model_dim), jnp.float32)
    pe = pe.at[:, 0::2].set(jnp.sin(pos / denom))
    pe = pe.at[:, 1::2].set(jnp.cos(pos / denom))
    return pe


# ---------------------------------------------------------------------------
# Main
# ---------------------------------------------------------------------------
if __name__ == "__main__":
    # Module hyper-parameters (small; D a multiple of 128 for lane-dense stores).
    max_sequence_len = 8
    model_dim = 128
    p_drop = 0.1

    START_TOKEN, END_TOKEN, PADDING_TOKEN = "<S>", "<E>", "<P>"
    chars = list("abcdefghijklmnopqrstuvwxyz ")
    vocab = chars + [START_TOKEN, END_TOKEN, PADDING_TOKEN]
    language2idx = {tok: i for i, tok in enumerate(vocab)}
    vocab_size = len(language2idx)

    # Deterministic parameter init (nn.Embedding weight ~ N(0,1)).
    key = jax.random.PRNGKey(0)
    key_emb, key_drop = jax.random.split(key)
    embedding_table = jax.random.normal(key_emb, (vocab_size, model_dim), dtype=jnp.float32)

    pe = positional_encoding(max_sequence_len, model_dim)

    # TODO(synk): string tokenization is host-side Python (no Pallas equivalent); ids enter the
    # kernel as int32 scalar-prefetch data.
    batch = ["hello", "tpu"]
    ids = batch_tokenize(batch, True, True, language2idx, max_sequence_len,
                         START_TOKEN, END_TOKEN, PADDING_TOKEN)             # (B, S) int32

    # Eval-mode forward (dropout is identity).
    out = sentence_embedding_pallas(ids, embedding_table, pe, p=p_drop, train=False)
    out = jax.block_until_ready(out)

    # Correctness check against the pure-JAX reference (embedding gather + PE).
    ref = embedding_table[ids] + pe[None, :, :]
    assert out.shape == (len(batch), max_sequence_len, model_dim)
    assert jnp.allclose(out, ref, atol=1e-5), "eval-mode mismatch vs reference"

    # Train-mode check: every element is either dropped (0) or scaled by 1/(1-p).
    out_tr = jax.block_until_ready(
        sentence_embedding_pallas(ids, embedding_table, pe, p=p_drop, train=True,
                                  rng_key=key_drop))
    assert out_tr.shape == out.shape
    scaled_ref = ref / (1.0 - p_drop)
    ok = jnp.all(jnp.isclose(out_tr, 0.0, atol=1e-6)
                 | jnp.isclose(out_tr, scaled_ref, atol=1e-4))
    assert bool(ok), "train-mode dropout output not consistent with reference"

    print("KERNEL_OK")
</pallas_src>

<mosaic_0001>
module attributes {stable_mosaic.version = 11 : i64} {
  func.func @_sentence_embedding_kernel(%arg0: i32, %arg1: memref<16xi32, #tpu.memory_space<smem>>, %arg2: memref<30x128xf32, #tpu.memory_space<any>>, %arg3: memref<16x128xf32, #tpu.memory_space<vmem>>, %arg4: memref<16x128xf32, #tpu.memory_space<vmem>>, %arg5: memref<16x128xf32, #tpu.memory_space<vmem>>, %arg6: memref<16x!tpu.dma_semaphore, #tpu.memory_space<semaphore_mem>>) attributes {dimension_semantics = [#tpu.dimension_semantics<parallel>], iteration_bounds = array<i64: 1>, scalar_prefetch = 1 : i64, scratch_operands = 2 : i64, tpu.core_type = #tpu.core_type<tc>, window_params = [{}, {pipeline_mode = #tpu.pipeline_mode<synchronous>, transform_indices = @transform_1, window_bounds = array<i64: 16, 128>}, {transform_indices = @transform_2, window_bounds = array<i64: 16, 128>}]} {
    %c16_i32 = arith.constant 16 : i32
    %0 = arith.muli %arg0, %c16_i32 : i32
    %c0_i32 = arith.constant 0 : i32
    %c16_i32_0 = arith.constant 16 : i32
    %1 = arith.addi %c0_i32, %c16_i32_0 : i32
    %c1_i32 = arith.constant 1 : i32
    scf.for %arg7 = %c0_i32 to %1 step %c1_i32  : i32 {
      %c1_i32_11 = arith.constant 1 : i32
      %7 = arith.muli %arg7, %c1_i32_11 : i32
      %c0_i32_12 = arith.constant 0 : i32
      %8 = arith.addi %c0_i32_12, %7 : i32
      %9 = arith.addi %0, %8 : i32
      %10 = arith.index_cast %9 : i32 to index
      %11 = memref.load %arg1[%10] : memref<16xi32, #tpu.memory_space<smem>>
      %c0_i32_13 = arith.constant 0 : i32
      %12 = tpu.memref_slice %arg2[%11, %c0_i32_13] : memref<30x128xf32, #tpu.memory_space<any>> -> memref<1x128xf32, #tpu.memory_space<any>>
      %13 = tpu.memref_squeeze %12 : memref<1x128xf32, #tpu.memory_space<any>> -> memref<128xf32, #tpu.memory_space<any>>
      %c0_i32_14 = arith.constant 0 : i32
      %14 = tpu.memref_slice %arg5[%8, %c0_i32_14] : memref<16x128xf32, #tpu.memory_space<vmem>> -> memref<1x128xf32, #tpu.memory_space<vmem>>
      %15 = tpu.memref_squeeze %14 : memref<1x128xf32, #tpu.memory_space<vmem>> -> memref<128xf32, #tpu.memory_space<vmem>>
      %16 = tpu.memref_slice %arg6[%8] : memref<16x!tpu.dma_semaphore, #tpu.memory_space<semaphore_mem>> -> memref<1x!tpu.dma_semaphore, #tpu.memory_space<semaphore_mem>>
      %17 = tpu.memref_squeeze %16 : memref<1x!tpu.dma_semaphore, #tpu.memory_space<semaphore_mem>> -> memref<!tpu.dma_semaphore, #tpu.memory_space<semaphore_mem>>
      tpu.enqueue_dma source(%13 : memref<128xf32, #tpu.memory_space<any>>) target(%15 : memref<128xf32, #tpu.memory_space<vmem>>) target_semaphore(%17 : memref<!tpu.dma_semaphore, #tpu.memory_space<semaphore_mem>>)
    }
    %c16_i32_1 = arith.constant 16 : i32
    %c0_i32_2 = arith.constant 0 : i32
    %c16_i32_3 = arith.constant 16 : i32
    %2 = arith.addi %c0_i32_2, %c16_i32_3 : i32
    %c1_i32_4 = arith.constant 1 : i32
    scf.for %arg7 = %c0_i32_2 to %2 step %c1_i32_4  : i32 {
      %c1_i32_11 = arith.constant 1 : i32
      %7 = arith.muli %arg7, %c1_i32_11 : i32
      %c0_i32_12 = arith.constant 0 : i32
      %8 = arith.addi %c0_i32_12, %7 : i32
      %c0_i32_13 = arith.constant 0 : i32
      %c0_i32_14 = arith.constant 0 : i32
      %9 = tpu.memref_slice %arg2[%c0_i32_13, %c0_i32_14] : memref<30x128xf32, #tpu.memory_space<any>> -> memref<1x128xf32, #tpu.memory_space<any>>
      %10 = tpu.memref_squeeze %9 : memref<1x128xf32, #tpu.memory_space<any>> -> memref<128xf32, #tpu.memory_space<any>>
      %c0_i32_15 = arith.constant 0 : i32
      %11 = tpu.memref_slice %arg5[%8, %c0_i32_15] : memref<16x128xf32, #tpu.memory_space<vmem>> -> memref<1x128xf32, #tpu.memory_space<vmem>>
      %12 = tpu.memref_squeeze %11 : memref<1x128xf32, #tpu.memory_space<vmem>> -> memref<128xf32, #tpu.memory_space<vmem>>
      %13 = tpu.memref_slice %arg6[%8] : memref<16x!tpu.dma_semaphore, #tpu.memory_space<semaphore_mem>> -> memref<1x!tpu.dma_semaphore, #tpu.memory_space<semaphore_mem>>
      %14 = tpu.memref_squeeze %13 : memref<1x!tpu.dma_semaphore, #tpu.memory_space<semaphore_mem>> -> memref<!tpu.dma_semaphore, #tpu.memory_space<semaphore_mem>>
      tpu.wait_dma2 semaphore(%14 : memref<!tpu.dma_semaphore, #tpu.memory_space<semaphore_mem>>) src(%10 : memref<128xf32, #tpu.memory_space<any>>) dst(%12 : memref<128xf32, #tpu.memory_space<vmem>>)
    }
    %c16_i32_5 = arith.constant 16 : i32
    %c0 = arith.constant 0 : index
    %c0_6 = arith.constant 0 : index
    %3 = vector.load %arg5[%c0, %c0_6] : memref<16x128xf32, #tpu.memory_space<vmem>>, vector<16x128xf32>
    %c0_7 = arith.constant 0 : index
    %c0_8 = arith.constant 0 : index
    %4 = vector.load %arg3[%c0_7, %c0_8] : memref<16x128xf32, #tpu.memory_space<vmem>>, vector<16x128xf32>
    %5 = arith.addf %3, %4 : vector<16x128xf32>
    %c0_9 = arith.constant 0 : index
    %c0_10 = arith.constant 0 : index
    %6 = vector.load %arg4[%c0_9, %c0_10] : memref<16x128xf32, #tpu.memory_space<vmem>>, vector<16x128xf32>
    tpu.vector_store %arg4[%c0_9, %c0_10], %5 {strides = array<i32>} : memref<16x128xf32, #tpu.memory_space<vmem>>, vector<16x128xf32>,
    return
  }
  func.func @transform_1(%arg0: i32, %arg1: memref<16xi32, #tpu.memory_space<smem>>) -> (i32, i32) {
    %c0_i32 = arith.constant 0 : i32
    %c0_i32_0 = arith.constant 0 : i32
    %c0_i32_1 = arith.constant 0 : i32
    return %c0_i32, %c0_i32_0 : i32, i32
  }
  func.func @transform_2(%arg0: i32, %arg1: memref<16xi32, #tpu.memory_space<smem>>) -> (i32, i32) {
    %c0_i32 = arith.constant 0 : i32
    %c0_i32_0 = arith.constant 0 : i32
    return %arg0, %c0_i32 : i32, i32
  }
}

</mosaic_0001>

<bundles_post_ra>
// kernel: tpu_custom_call.1
= control target key start
LH: loop header
LB: loop body
LE: loop exit
PB: predicated region body
PF: predicated region fallthrough
CT: control target
= control target key end

     0   :  { %s345_s12 = smov [#allocation5]   ;;  %s406_s0 = inlined_call_operand.hbm [shape: s32[16], index: 0, kind: input, shape index: {}]   ;;  %s407_s1 = inlined_call_operand.hbm [shape: f32[30,128], index: 1, kind: input, shape index: {}]   ;;  %s408_s2 = inlined_call_operand.hbm [shape: f32[16,128], index: 2, kind: input, shape index: {}]   ;;  %s409_s3 = inlined_call_operand.hbm [shape: f32[16,128], index: 3, kind: output, shape index: {}]  }
   0x1   :  { %9 = dma.hbm_to_smem %s406_s0, 16, %s345_s12, [#allocation4] }
   0x2   :  { %329 = dma.done.wait [#allocation4], 16 }
   0x3   :  { %330 = vsyncadd [#allocation4], 4294967280 }
   0x4   :  { %11 = sfence }
   0x5   :  { %12 = vsyncpa [#allocation7], 0 }
   0x6   :  { %13 = vsyncpa [#allocation8], 0  ;;  %s346_s15 = smov [#allocation6]  }
   0x7   :  { %s19_s16 = sshll.u32 %s346_s15, 4  ;;  %s20_s16 = int_to_ptr.vmem [resolvable:$true] %s19_s16 }
   0x8   :  { %s267_s17 = scalar_lea.vmem %s20_s16, 256  ;;  %p272_p1 = scmp.lt.s32.totalorder %s20_s16, %s20_s16 }
   0x9   :  { %p268_p0 = scmp.ne.s32.totalorder %s20_s16, %s267_s17  ;;  %p273_p2 = scmp.lt.s32.totalorder %s267_s17, %s267_s17 }
   0xb   :  { %p274_p3 = por %p273_p2, %p272_p1 }
   0xd   :  { %p275_p4 = pnand %p274_p3, %p268_p0 }
   0xf   :  { %278 = shalt.err (!%p275_p4)
}
  0x10   :  { %s347_s18 = smov 128   ;;  %s348_s19 = smov 8  }
  0x11   :  { %25 = dma.hbm_to_vmem [thread:$0]  %s408_s2, 256, %s20_s16, [#allocation7], %s347_s18, %s347_s18, %s348_s19  }
  0x12   :  { %331 = dma.done.wait [#allocation7], 256  }
  0x13   :  { %332 = vsyncadd [#allocation7], 4294967040  ;;  %s380_s21 = smov 0  }
  0x14 LB: > { %s37_s22 = sld [smem:[#allocation5 + %s339_s21]]  ;;  %s40_s23 = scalar_lea.vmem [#allocation2], %s339_s21  ;;  %s339_s21 = sphi %s380_s21, %s35_s21  }
  0x15   : > { %s49_s24 = sshll.u32 %s40_s23, 4  ;;  %s41_s28 = scalar_lea.sflag [#allocation3], %s339_s21  ;;  %s50_s24 = int_to_ptr.vmem [resolvable:$true] %s49_s24 }
  0x16   : > { %s281_s5 = scalar_lea.hbm %s407_s1, 512 }
  0x1a   : > { %s213_s25 = sshll.u32 %s37_s22, 4 }
  0x1b   : > { %s39_s2 = scalar_lea.hbm %s407_s1, %s213_s25 }
  0x1c   : > { %s279_s29 = scalar_lea.hbm %s39_s2, 16  ;;  %p282_p6 = scmp.lt.s32.totalorder %s39_s2, %s407_s1 }
  0x1d   : > { %p280_p5 = scmp.ne.s32.totalorder %s39_s2, %s279_s29  ;;  %p283_p7 = scmp.lt.s32.totalorder %s281_s5, %s279_s29 }
  0x1f   : > { %p284_p8 = por %p283_p7, %p282_p6 }
  0x21   : > { %p285_p9 = pnand %p284_p8, %p280_p5 }
  0x23   : > { %288 = shalt.err (!%p285_p9)  }
  0x24   : > { %s289_s8 = scalar_lea.vmem %s50_s24, 16  ;;  %s349_s9 = smov [#allocation2]  }
  0x25   : > { %p290_p10 = scmp.ne.s32.totalorder %s50_s24, %s289_s8  ;;  %s291_s10 = sshll.u32 %s349_s9, 4  ;;  %s292_s10 = int_to_ptr.vmem [resolvable:$false] %s291_s10 }
  0x26   : > { %s293_s11 = scalar_lea.vmem %s292_s10, 256  ;;  %p294_p11 = scmp.lt.s32.totalorder %s50_s24, %s292_s10 }
  0x27   : > { %p295_p12 = scmp.lt.s32.totalorder %s293_s11, %s289_s8 }
  0x29   : > { %p296_p13 = por %p295_p12, %p294_p11 }
  0x2b   : > { %p297_p0 = pnand %p296_p13, %p290_p10 }
  0x2d   : > { %300 = shalt.err (!%p297_p0)  }
  0x2e   : > { %52 = dma.hbm_to_vmem [thread:$0]  %s39_s2, 16, %s50_s24, %s41_s28 }
  0x2f   : > { %s35_s21 = sadd.s32 1, %s339_s21  }
  0x30   : > { %p32_p1 = scmp.ge.s32.totalorder %s35_s21, 16  }
  0x31   :  { %s341_s12 = smov (%p32_p1), 0  }
  0x32   :  { %34 = sbr.rel (!%p32_p1) target bundleno = 20 (0x14), region = 65 }
  0x37 LB: > { %s59_s13 = scalar_lea.sflag [#allocation3], %s343_s12  ;;  %s343_s12 = sphi %s341_s12, %s58_s12  }
  0x38   : > { %333 = dma.done.wait %s59_s13, 16 }
  0x39   : > { %334 = vsyncadd %s59_s13, 4294967280  ;;  %s58_s12 = sadd.s32 1, %s343_s12  }
  0x3a   : > { %p55_p2 = scmp.ge.s32.totalorder %s58_s12, 16  }
  0x3b   :  { %v62_v0 = vld [vmem:[#allocation2] sm:$0xff] (%p55_p2)  ;;  %v64_v1 = vld [vmem:[#allocation6] sm:$0xff] (%p55_p2)  ;;  %v63_v2 = vld [vmem:[#allocation2 + $0x8] sm:$0xff] (%p55_p2)  ;;  %s350_s14 = smov (%p55_p2), [#allocation9]  }
  0x3c   :  { %57 = sbr.rel (!%p55_p2) target bundleno = 55 (0x37), region = 76  ;;  %v66_v3 = vadd.f32 (%p55_p2), %v64_v1, %v62_v0  ;;  %v65_v4 = vld [vmem:[#allocation6 + $0x8] sm:$0xff] (%p55_p2)  ;;  %s75_s15 = sshll.u32 (%p55_p2), %s350_s14, 4  ;;  %s76_s15 = int_to_ptr.vmem [resolvable:$true] %s75_s15 }
  0x3d   :  { %v67_v5 = vadd.f32 (%p55_p2), %v65_v4, %v63_v2  ;;  %s301_s1 = scalar_lea.vmem (%p55_p2), %s76_s15, 256  ;;  %p306_p4 = scmp.lt.s32.totalorder (%p55_p2), %s76_s15, %s76_s15 }
  0x3e   :  { %68 = vst [vmem:[#allocation9] sm:$0xff] (%p55_p2), %v66_v3  ;;  %p302_p3 = scmp.ne.s32.totalorder (%p55_p2), %s76_s15, %s301_s1  ;;  %p307_p5 = scmp.lt.s32.totalorder (%p55_p2), %s301_s1, %s301_s1 }
  0x3f   :  { %69 = vst [vmem:[#allocation9 + $0x8] sm:$0xff] (%p55_p2), %v67_v5 }
  0x40   :  { %p308_p6 = por (%p55_p2), %p307_p5, %p306_p4 }
  0x42   :  { %p309_p7 = pnand %p308_p6, %p302_p3 }
  0x44   :  { %312 = shalt.err (!%p309_p7)
}
  0x45   :  { %81 = dma.vmem_to_hbm [thread:$0]  %s76_s15, 256, %s409_s3, [#allocation8], %s347_s18, %s347_s18, %s348_s19  }
  0x46   :  { %335 = dma.done.wait [#allocation8], 256  }
  0x47   :  { %336 = vsyncadd [#allocation8], 4294967040 }
  0x48   :  { %85 = vsyncpa [#allocation7], 1 }
  0x49   :  { %86 = vsyncpa [#allocation8], 1 }
  0x4a   :  { %87 = vsyncmov [#allocation3] }
  0x4d   :  { %s88_s0 = vpop.sfrf %87 }
  0x4e   :  { %p214_p8 = scmp.ne.s32.totalorder %s88_s0, 0 }
  0x50   :  { %92 = shalt.err (%p214_p8)  }
  0x51   :  { %94 = vsyncmov [#allocation3 + $0x1] }
  0x54   :  { %s95_s20 = vpop.sfrf %94 }
  0x55   :  { %p215_p9 = scmp.ne.s32.totalorder %s95_s20, 0 }
  0x57   :  { %99 = shalt.err (%p215_p9)  }
  0x58   :  { %101 = vsyncmov [#allocation3 + $0x2] }
  0x5b   :  { %s102_s21 = vpop.sfrf %101 }
  0x5c   :  { %p216_p10 = scmp.ne.s32.totalorder %s102_s21, 0 }
  0x5e   :  { %106 = shalt.err (%p216_p10)  }
  0x5f   :  { %108 = vsyncmov [#allocation3 + $0x3] }
  0x62   :  { %s109_s22 = vpop.sfrf %108 }
  0x63   :  { %p217_p11 = scmp.ne.s32.totalorder %s109_s22, 0 }
  0x65   :  { %113 = shalt.err (%p217_p11)  }
  0x66   :  { %115 = vsyncmov [#allocation3 + $0x4] }
  0x69   :  { %s116_s3 = vpop.sfrf %115 }
  0x6a   :  { %p218_p12 = scmp.ne.s32.totalorder %s116_s3, 0 }
  0x6c   :  { %120 = shalt.err (%p218_p12)  }
  0x6d   :  { %122 = vsyncmov [#allocation3 + $0x5] }
  0x70   :  { %s123_s18 = vpop.sfrf %122 }
  0x71   :  { %p219_p13 = scmp.ne.s32.totalorder %s123_s18, 0 }
  0x73   :  { %127 = shalt.err (%p219_p13)  }
  0x74   :  { %129 = vsyncmov [#allocation3 + $0x6] }
  0x77   :  { %s130_s19 = vpop.sfrf %129 }
  0x78   :  { %p220_p0 = scmp.ne.s32.totalorder %s130_s19, 0 }
  0x7a   :  { %134 = shalt.err (%p220_p0)  }
  0x7b   :  { %136 = vsyncmov [#allocation3 + $0x7] }
  0x7e   :  { %s137_s23 = vpop.sfrf %136 }
  0x7f   :  { %p221_p1 = scmp.ne.s32.totalorder %s137_s23, 0 }
  0x81   :  { %141 = shalt.err (%p221_p1)  }
  0x82   :  { %143 = vsyncmov [#allocation3 + $0x8] }
  0x85   :  { %s144_s24 = vpop.sfrf %143 }
  0x86   :  { %p222_p2 = scmp.ne.s32.totalorder %s144_s24, 0 }
  0x88   :  { %148 = shalt.err (%p222_p2)  }
  0x89   :  { %150 = vsyncmov [#allocation3 + $0x9] }
  0x8c   :  { %s151_s25 = vpop.sfrf %150 }
  0x8d   :  { %p223_p3 = scmp.ne.s32.totalorder %s151_s25, 0 }
  0x8f   :  { %155 = shalt.err (%p223_p3)  }
  0x90   :  { %157 = vsyncmov [#allocation3 + $0xa] }
  0x93   :  { %s158_s26 = vpop.sfrf %157 }
  0x94   :  { %p224_p4 = scmp.ne.s32.totalorder %s158_s26, 0 }
  0x96   :  { %162 = shalt.err (%p224_p4)  }
  0x97   :  { %164 = vsyncmov [#allocation3 + $0xb] }
  0x9a   :  { %s165_s27 = vpop.sfrf %164 }
  0x9b   :  { %p225_p5 = scmp.ne.s32.totalorder %s165_s27, 0 }
  0x9d   :  { %169 = shalt.err (%p225_p5)  }
  0x9e   :  { %171 = vsyncmov [#allocation3 + $0xc] }
  0xa1   :  { %s172_s2 = vpop.sfrf %171 }
  0xa2   :  { %p226_p6 = scmp.ne.s32.totalorder %s172_s2, 0 }
  0xa4   :  { %176 = shalt.err (%p226_p6)  }
  0xa5   :  { %178 = vsyncmov [#allocation3 + $0xd] }
  0xa8   :  { %s179_s28 = vpop.sfrf %178 }
  0xa9   :  { %p227_p7 = scmp.ne.s32.totalorder %s179_s28, 0 }
  0xab   :  { %183 = shalt.err (%p227_p7)  }
  0xac   :  { %185 = vsyncmov [#allocation3 + $0xe] }
  0xaf   :  { %s186_s29 = vpop.sfrf %185 }
  0xb0   :  { %p228_p8 = scmp.ne.s32.totalorder %s186_s29, 0 }
  0xb2   :  { %190 = shalt.err (%p228_p8)  }
  0xb3   :  { %192 = vsyncmov [#allocation3 + $0xf] }
  0xb6   :  { %s193_s30 = vpop.sfrf %192 }
  0xb7   :  { %p229_p9 = scmp.ne.s32.totalorder %s193_s30, 0 }
  0xb9   :  { %197 = shalt.err (%p229_p9)  }

</bundles_post_ra>
